<compile_context>
chip_gen: v7x
topology: tpu7x:2x2x1
jax: 0.10.0
libtpu: 0.0.40
codegen_flags: <defaults>
</compile_context>

<pallas_src>
import jax
import jax.numpy as jnp
from jax.experimental import pallas as pl
from jax.experimental.pallas import tpu as pltpu


# ----------------------------------------------------------------------------
# Primary path: IdentityMap.forward(x) -> x.  Zero work, zero HBM traffic.
# ----------------------------------------------------------------------------
def identity_map(x: jax.Array, *args, **kwargs) -> jax.Array:
    """Pallas-side equivalent of IdentityMap.forward: return x unchanged."""
    return x


def identity_map_config():
    """Mirrors the PyTorch module's `config` property."""
    return {"mm_projector_type": "identity"}


# ----------------------------------------------------------------------------
# Optional path: materialize a fresh copy of x via a single HBM->HBM DMA.
# (Only useful if a caller requires a distinct output buffer.)
# ----------------------------------------------------------------------------
def _hbm_copy_kernel(x_hbm, o_hbm, sem):
    # Whole-array HBM->HBM DMA: start, then wait for completion.  No VMEM
    # staging, no TensorCore vector load/store slots consumed.
    cp = pltpu.make_async_copy(x_hbm, o_hbm, sem)
    cp.start()
    cp.wait()


def identity_map_copy(x: jax.Array) -> jax.Array:
    """Out-of-place identity: returns a fresh buffer holding the same bytes."""
    if x.size == 0:
        # Nothing to DMA; hand back an (empty) array of the right shape/dtype.
        return jnp.asarray(x)

    return pl.pallas_call(
        _hbm_copy_kernel,
        out_shape=jax.ShapeDtypeStruct(x.shape, x.dtype),
        in_specs=[pl.BlockSpec(memory_space=pl.ANY)],   # stay in HBM, no auto-DMA
        out_specs=pl.BlockSpec(memory_space=pl.ANY),    # stay in HBM, no auto-DMA
        scratch_shapes=[pltpu.SemaphoreType.DMA(())],   # one DMA-completion sem
    )(x)


if __name__ == "__main__":
    key = jax.random.PRNGKey(0)
    # Small activation-like input: batch=2, seq=8, hidden=32.
    x = jax.random.normal(key, (2, 8, 32), dtype=jnp.float32)
    x_expected = jnp.array(x, copy=True)

    # 1) True forward semantics: identity, zero work.
    y = identity_map(x)
    jax.block_until_ready(y)
    assert y.shape == x_expected.shape
    assert y.dtype == x_expected.dtype
    assert bool(jnp.array_equal(y, x_expected))

    # 2) Exercise the Pallas HBM->HBM copy kernel once (fresh output buffer).
    y_copy = identity_map_copy(x)
    jax.block_until_ready(y_copy)
    assert y_copy.shape == x_expected.shape
    assert y_copy.dtype == x_expected.dtype
    assert bool(jnp.array_equal(y_copy, x_expected))

    assert identity_map_config() == {"mm_projector_type": "identity"}

    print("KERNEL_OK")
</pallas_src>

<mosaic_0001>
module attributes {stable_mosaic.version = 11 : i64} {
  func.func @_hbm_copy_kernel(%arg0: memref<2x8x32xf32, #tpu.memory_space<any>>, %arg1: memref<2x8x32xf32, #tpu.memory_space<any>>, %arg2: memref<!tpu.dma_semaphore, #tpu.memory_space<semaphore_mem>>) attributes {dimension_semantics = [], scalar_prefetch = 0 : i64, scratch_operands = 1 : i64, tpu.core_type = #tpu.core_type<tc>} {
    tpu.enqueue_dma source(%arg0 : memref<2x8x32xf32, #tpu.memory_space<any>>) target(%arg1 : memref<2x8x32xf32, #tpu.memory_space<any>>) target_semaphore(%arg2 : memref<!tpu.dma_semaphore, #tpu.memory_space<semaphore_mem>>)
    tpu.wait_dma2 semaphore(%arg2 : memref<!tpu.dma_semaphore, #tpu.memory_space<semaphore_mem>>) src(%arg0 : memref<2x8x32xf32, #tpu.memory_space<any>>) dst(%arg1 : memref<2x8x32xf32, #tpu.memory_space<any>>)
    return
  }
}

</mosaic_0001>

<bundles_post_ra>
// kernel: tpu_custom_call.1
= control target key start
LH: loop header
LB: loop body
LE: loop exit
PB: predicated region body
PF: predicated region fallthrough
CT: control target
= control target key end

     0   :  { %s35_s6 = smov [#allocation2]   ;;  %s36_s7 = smov [#allocation3]   ;;  %s54_s0 = inlined_call_operand.hbm [shape: f32[2,8,32], index: 0, kind: input, shape index: {}]   ;;  %s55_s1 = inlined_call_operand.hbm [shape: f32[2,8,32], index: 1, kind: output, shape index: {}]  }
   0x1   :  { %s37_s8 = smov 0  }
   0x2   :  { %18 = dma.general %s54_s0, 256, %s55_s1, %s35_s6, %s36_s7, [#allocation4], %s37_s8, 0  }
   0x3   :  { %33 = dma.done.wait [#allocation2], 256 }
   0x4   :  { %34 = vsyncadd [#allocation2], 4294967040 }
   0x5   :  { %23 = vsyncmov [#allocation2] }
   0x8   :  { %s24_s13 = vpop.sfrf %23 }
   0x9   :  { %p29_p0 = scmp.ne.s32.totalorder %s24_s13, 0 }
   0xb   :  { %28 = shalt.err (%p29_p0)  }

</bundles_post_ra>
